<compile_context>
chip_gen: v6e
topology: v6e:2x2x1
jax: 0.10.0
libtpu: 0.0.40
codegen_flags: <defaults>
</compile_context>

<pallas_src>
import functools

import jax
import jax.numpy as jnp
from jax import lax
from jax.experimental import pallas as pl
from jax.experimental.pallas import tpu as pltpu

BN_EPS = 1e-5
H1, H2 = 512, 256
LANE = 128


def _round_up(n, m):
    return ((n + m - 1) // m) * m


def mlp_kernel(x_ref, w1_ref, w2_ref, w3_ref, vec_ref, out_ref):
    # x arrives as f32; cast to bf16 for the MXU only. Weights are pre-cast bf16.
    x = x_ref[...].astype(jnp.bfloat16)
    inv_b = 1.0 / x.shape[0]

    # Static, lane-aligned slices of the fused parameter row:
    #   [ g1 (512) | be1 (512) | g2 (256) | be2 (256) | b3_padded (out_pad) ]
    g1 = vec_ref[:, 0:H1]
    be1 = vec_ref[:, H1:2 * H1]
    g2 = vec_ref[:, 2 * H1:2 * H1 + H2]
    be2 = vec_ref[:, 2 * H1 + H2:2 * (H1 + H2)]
    b3 = vec_ref[:, 2 * (H1 + H2):]

    # ---- Layer 1: Linear -> BatchNorm1d(512) -> ReLU ----
    # (Linear bias dropped: cancelled by the BN mean subtraction.)
    h1 = jnp.dot(x, w1_ref[...], preferred_element_type=jnp.float32)
    mu1 = jnp.sum(h1, axis=0, keepdims=True) * inv_b
    c1 = h1 - mu1                                    # centered, reused twice
    var1 = jnp.sum(c1 * c1, axis=0, keepdims=True) * inv_b
    scale1 = lax.rsqrt(var1 + BN_EPS) * g1           # fold per-feature scale
    h1 = jnp.maximum(c1 * scale1 + be1, 0.0)

    # ---- Layer 2: Linear -> BatchNorm1d(256) -> ReLU ----
    h2 = jnp.dot(h1.astype(jnp.bfloat16), w2_ref[...],
                 preferred_element_type=jnp.float32)
    mu2 = jnp.sum(h2, axis=0, keepdims=True) * inv_b
    c2 = h2 - mu2
    var2 = jnp.sum(c2 * c2, axis=0, keepdims=True) * inv_b
    scale2 = lax.rsqrt(var2 + BN_EPS) * g2
    h2 = jnp.maximum(c2 * scale2 + be2, 0.0)

    # ---- Output layer: Linear (bias kept) -> ReLU, lane-dense padded store ----
    y = jnp.dot(h2.astype(jnp.bfloat16), w3_ref[...],
                preferred_element_type=jnp.float32) + b3
    out_ref[...] = jnp.maximum(y, 0.0)


def prepare_params(params):
    """One-time, off-the-hot-path preparation of kernel-ready parameters.

    Returns (w1_bf16, w2_bf16, w3_bf16_padded, fused_vec_f32, out_dim).
    b1/b2 are intentionally dropped (cancelled by BatchNorm mean subtraction).
    """
    (w1, b1, g1, be1, w2, b2, g2, be2, w3, b3) = params
    del b1, b2
    out_dim = w3.shape[1]
    out_pad = _round_up(out_dim, LANE)

    # bf16 weights: half the weight DMA bytes, 2x MXU throughput.
    w1b = w1.astype(jnp.bfloat16)
    w2b = w2.astype(jnp.bfloat16)
    # Pad output feature dim to a multiple of 128 -> lane-dense last matmul/store.
    w3p = jnp.zeros((H2, out_pad), jnp.float32).at[:, :out_dim].set(w3)
    w3b = w3p.astype(jnp.bfloat16)
    b3p = jnp.zeros((1, out_pad), jnp.float32).at[:, :out_dim].set(b3)
    # Fuse the five tiny per-feature rows into one DMA.
    vec = jnp.concatenate([g1, be1, g2, be2, b3p], axis=1)
    return (jax.device_put(w1b), jax.device_put(w2b), jax.device_put(w3b),
            jax.device_put(vec), out_dim)


@functools.partial(jax.jit, static_argnames=("out_dim",))
def model_mlp_forward(x, w1b, w2b, w3b, vec, *, out_dim):
    """x: [B, ...] (flattened to [B, input_dim] like x.view(B, -1)), f32."""
    B = x.shape[0]
    x2d = x.reshape(B, -1)                 # stays f32; cast happens in-kernel
    d_in = x2d.shape[1]
    out_pad = w3b.shape[1]

    flops = 2 * B * (d_in * H1 + H1 * H2 + H2 * out_pad)
    bytes_accessed = (
        x2d.size * 4                                   # f32 input
        + (w1b.size + w2b.size + w3b.size) * 2         # bf16 weights
        + vec.size * 4                                 # fused f32 param row
        + B * out_pad * 4                              # f32 output
    )
    cost = pl.CostEstimate(flops=flops,
                           transcendentals=H1 + H2,    # two rsqrt row-vectors
                           bytes_accessed=bytes_accessed)

    vmem = pl.BlockSpec(memory_space=pltpu.MemorySpace.VMEM)
    out_padded = pl.pallas_call(
        mlp_kernel,
        out_shape=jax.ShapeDtypeStruct((B, out_pad), jnp.float32),
        in_specs=[vmem] * 5,
        out_specs=vmem,
        cost_estimate=cost,
        compiler_params=pltpu.CompilerParams(vmem_limit_bytes=32 * 1024 * 1024),
    )(x2d, w1b, w2b, w3b, vec)
    return out_padded[:, :out_dim]


def init_params(key, input_dim, output_dim):
    """PyTorch-default-style init.
    Linear: U(-1/sqrt(fan_in), 1/sqrt(fan_in)) for W and b (W stored [in, out]).
    BatchNorm1d: gamma=1, beta=0."""
    dims = [(input_dim, H1), (H1, H2), (H2, output_dim)]
    keys = jax.random.split(key, 6)
    lin = []
    for i, (fan_in, fan_out) in enumerate(dims):
        bound = 1.0 / jnp.sqrt(fan_in)
        w = jax.random.uniform(keys[2 * i], (fan_in, fan_out),
                               minval=-bound, maxval=bound, dtype=jnp.float32)
        b = jax.random.uniform(keys[2 * i + 1], (1, fan_out),
                               minval=-bound, maxval=bound, dtype=jnp.float32)
        lin.append((w, b))
    (w1, b1), (w2, b2), (w3, b3) = lin
    g1, be1 = jnp.ones((1, H1), jnp.float32), jnp.zeros((1, H1), jnp.float32)
    g2, be2 = jnp.ones((1, H2), jnp.float32), jnp.zeros((1, H2), jnp.float32)
    return (w1, b1, g1, be1, w2, b2, g2, be2, w3, b3)


def reference_forward(x, params):
    """Pure-JAX reference with the SAME numerics (bf16 dot operands, f32
    accumulation, f32 BN) and the full PyTorch math including b1/b2 — the
    kernel drops b1/b2 because BN cancels them."""
    (w1, b1, g1, be1, w2, b2, g2, be2, w3, b3) = params
    B = x.shape[0]
    xf = x.reshape(B, -1).astype(jnp.bfloat16)

    def bn(h, g, be):
        mu = jnp.mean(h, axis=0, keepdims=True)
        var = jnp.mean((h - mu) ** 2, axis=0, keepdims=True)
        return (h - mu) * lax.rsqrt(var + BN_EPS) * g + be

    h1 = jnp.dot(xf, w1.astype(jnp.bfloat16),
                 preferred_element_type=jnp.float32) + b1
    h1 = jax.nn.relu(bn(h1, g1, be1))
    h2 = jnp.dot(h1.astype(jnp.bfloat16), w2.astype(jnp.bfloat16),
                 preferred_element_type=jnp.float32) + b2
    h2 = jax.nn.relu(bn(h2, g2, be2))
    y = jnp.dot(h2.astype(jnp.bfloat16), w3.astype(jnp.bfloat16),
                preferred_element_type=jnp.float32) + b3
    return jax.nn.relu(y)


if __name__ == "__main__":
    key = jax.random.PRNGKey(0)
    k_x, k_p = jax.random.split(key)

    batch, output_dim = 8, 16
    x = jax.random.normal(k_x, (batch, 4, 4, 4), dtype=jnp.float32)  # flattens to 64
    input_dim = 4 * 4 * 4
    params = init_params(k_p, input_dim, output_dim)

    # One-time preparation (off the per-call hot path).
    w1b, w2b, w3b, vec, out_dim = prepare_params(params)

    out = model_mlp_forward(x, w1b, w2b, w3b, vec, out_dim=out_dim)
    out = jax.block_until_ready(out)

    ref = reference_forward(x, params)
    assert out.shape == (batch, output_dim)
    assert jnp.allclose(out, ref, atol=1e-2, rtol=1e-2), "mismatch vs reference"

    print("KERNEL_OK")
</pallas_src>

<mosaic_0001>
module attributes {stable_mosaic.version = 11 : i64} {
  func.func @mlp_kernel(%arg0: memref<8x64xf32, #tpu.memory_space<vmem>>, %arg1: memref<64x512xbf16, #tpu.memory_space<vmem>>, %arg2: memref<512x256xbf16, #tpu.memory_space<vmem>>, %arg3: memref<256x128xbf16, #tpu.memory_space<vmem>>, %arg4: memref<1x1664xf32, #tpu.memory_space<vmem>>, %arg5: memref<8x128xf32, #tpu.memory_space<vmem>>) attributes {dimension_semantics = [], scalar_prefetch = 0 : i64, scratch_operands = 0 : i64, tpu.core_type = #tpu.core_type<tc>} {
    %c0 = arith.constant 0 : index
    %c0_0 = arith.constant 0 : index
    %0 = vector.load %arg0[%c0, %c0_0] : memref<8x64xf32, #tpu.memory_space<vmem>>, vector<8x64xf32>
    %1 = arith.truncf %0 : vector<8x64xf32> to vector<8x64xbf16>
    %c0_1 = arith.constant 0 : index
    %c0_2 = arith.constant 0 : index
    %2 = vector.load %arg4[%c0_1, %c0_2] : memref<1x1664xf32, #tpu.memory_space<vmem>>, vector<1x512xf32>
    %c0_3 = arith.constant 0 : index
    %c512 = arith.constant 512 : index
    %3 = vector.load %arg4[%c0_3, %c512] : memref<1x1664xf32, #tpu.memory_space<vmem>>, vector<1x512xf32>
    %c0_4 = arith.constant 0 : index
    %c1024 = arith.constant 1024 : index
    %4 = vector.load %arg4[%c0_4, %c1024] : memref<1x1664xf32, #tpu.memory_space<vmem>>, vector<1x256xf32>
    %c0_5 = arith.constant 0 : index
    %c1280 = arith.constant 1280 : index
    %5 = vector.load %arg4[%c0_5, %c1280] : memref<1x1664xf32, #tpu.memory_space<vmem>>, vector<1x256xf32>
    %c0_6 = arith.constant 0 : index
    %c1536 = arith.constant 1536 : index
    %6 = vector.load %arg4[%c0_6, %c1536] : memref<1x1664xf32, #tpu.memory_space<vmem>>, vector<1x128xf32>
    %c0_7 = arith.constant 0 : index
    %c0_8 = arith.constant 0 : index
    %7 = vector.load %arg1[%c0_7, %c0_8] : memref<64x512xbf16, #tpu.memory_space<vmem>>, vector<64x512xbf16>
    %cst = arith.constant dense<0.000000e+00> : vector<8x512xf32>
    %8 = tpu.matmul %1, %7, %cst {dimension_numbers = #tpu.dot_dimension_numbers<[1], [0], [0], [1], [0, 0, 1, 1], [], []>} : vector<8x64xbf16>, vector<64x512xbf16>, vector<8x512xf32> -> vector<8x512xf32>
    %cst_9 = arith.constant dense<0.000000e+00> : vector<512xf32>
    %9 = vector.multi_reduction <add>, %8, %cst_9 [0] : vector<8x512xf32> to vector<512xf32>
    %10 = vector.shape_cast %9 : vector<512xf32> to vector<1x512xf32>
    %cst_10 = arith.constant 1.250000e-01 : f32
    %11 = vector.broadcast %cst_10 : f32 to vector<1x512xf32>
    %12 = arith.mulf %10, %11 : vector<1x512xf32>
    %13 = vector.broadcast %12 : vector<1x512xf32> to vector<8x512xf32>
    %14 = arith.subf %8, %13 : vector<8x512xf32>
    %15 = arith.mulf %14, %14 : vector<8x512xf32>
    %cst_11 = arith.constant dense<0.000000e+00> : vector<512xf32>
    %16 = vector.multi_reduction <add>, %15, %cst_11 [0] : vector<8x512xf32> to vector<512xf32>
    %17 = vector.shape_cast %16 : vector<512xf32> to vector<1x512xf32>
    %cst_12 = arith.constant 1.250000e-01 : f32
    %18 = vector.broadcast %cst_12 : f32 to vector<1x512xf32>
    %19 = arith.mulf %17, %18 : vector<1x512xf32>
    %cst_13 = arith.constant 9.99999974E-6 : f32
    %20 = vector.broadcast %cst_13 : f32 to vector<1x512xf32>
    %21 = arith.addf %19, %20 : vector<1x512xf32>
    %22 = math.rsqrt %21 : vector<1x512xf32>
    %23 = arith.mulf %22, %2 : vector<1x512xf32>
    %24 = vector.broadcast %23 : vector<1x512xf32> to vector<8x512xf32>
    %25 = arith.mulf %14, %24 : vector<8x512xf32>
    %26 = vector.broadcast %3 : vector<1x512xf32> to vector<8x512xf32>
    %27 = arith.addf %25, %26 : vector<8x512xf32>
    %cst_14 = arith.constant 0.000000e+00 : f32
    %28 = vector.broadcast %cst_14 : f32 to vector<8x512xf32>
    %29 = arith.maximumf %27, %28 : vector<8x512xf32>
    %30 = arith.truncf %29 : vector<8x512xf32> to vector<8x512xbf16>
    %c0_15 = arith.constant 0 : index
    %c0_16 = arith.constant 0 : index
    %31 = vector.load %arg2[%c0_15, %c0_16] : memref<512x256xbf16, #tpu.memory_space<vmem>>, vector<512x256xbf16>
    %cst_17 = arith.constant dense<0.000000e+00> : vector<8x256xf32>
    %32 = tpu.matmul %30, %31, %cst_17 {dimension_numbers = #tpu.dot_dimension_numbers<[1], [0], [0], [1], [0, 0, 1, 1], [], []>} : vector<8x512xbf16>, vector<512x256xbf16>, vector<8x256xf32> -> vector<8x256xf32>
    %cst_18 = arith.constant dense<0.000000e+00> : vector<256xf32>
    %33 = vector.multi_reduction <add>, %32, %cst_18 [0] : vector<8x256xf32> to vector<256xf32>
    %34 = vector.shape_cast %33 : vector<256xf32> to vector<1x256xf32>
    %cst_19 = arith.constant 1.250000e-01 : f32
    %35 = vector.broadcast %cst_19 : f32 to vector<1x256xf32>
    %36 = arith.mulf %34, %35 : vector<1x256xf32>
    %37 = vector.broadcast %36 : vector<1x256xf32> to vector<8x256xf32>
    %38 = arith.subf %32, %37 : vector<8x256xf32>
    %39 = arith.mulf %38, %38 : vector<8x256xf32>
    %cst_20 = arith.constant dense<0.000000e+00> : vector<256xf32>
    %40 = vector.multi_reduction <add>, %39, %cst_20 [0] : vector<8x256xf32> to vector<256xf32>
    %41 = vector.shape_cast %40 : vector<256xf32> to vector<1x256xf32>
    %cst_21 = arith.constant 1.250000e-01 : f32
    %42 = vector.broadcast %cst_21 : f32 to vector<1x256xf32>
    %43 = arith.mulf %41, %42 : vector<1x256xf32>
    %cst_22 = arith.constant 9.99999974E-6 : f32
    %44 = vector.broadcast %cst_22 : f32 to vector<1x256xf32>
    %45 = arith.addf %43, %44 : vector<1x256xf32>
    %46 = math.rsqrt %45 : vector<1x256xf32>
    %47 = arith.mulf %46, %4 : vector<1x256xf32>
    %48 = vector.broadcast %47 : vector<1x256xf32> to vector<8x256xf32>
    %49 = arith.mulf %38, %48 : vector<8x256xf32>
    %50 = vector.broadcast %5 : vector<1x256xf32> to vector<8x256xf32>
    %51 = arith.addf %49, %50 : vector<8x256xf32>
    %cst_23 = arith.constant 0.000000e+00 : f32
    %52 = vector.broadcast %cst_23 : f32 to vector<8x256xf32>
    %53 = arith.maximumf %51, %52 : vector<8x256xf32>
    %54 = arith.truncf %53 : vector<8x256xf32> to vector<8x256xbf16>
    %c0_24 = arith.constant 0 : index
    %c0_25 = arith.constant 0 : index
    %55 = vector.load %arg3[%c0_24, %c0_25] : memref<256x128xbf16, #tpu.memory_space<vmem>>, vector<256x128xbf16>
    %cst_26 = arith.constant dense<0.000000e+00> : vector<8x128xf32>
    %56 = tpu.matmul %54, %55, %cst_26 {dimension_numbers = #tpu.dot_dimension_numbers<[1], [0], [0], [1], [0, 0, 1, 1], [], []>} : vector<8x256xbf16>, vector<256x128xbf16>, vector<8x128xf32> -> vector<8x128xf32>
    %57 = vector.broadcast %6 : vector<1x128xf32> to vector<8x128xf32>
    %58 = arith.addf %56, %57 : vector<8x128xf32>
    %cst_27 = arith.constant 0.000000e+00 : f32
    %59 = vector.broadcast %cst_27 : f32 to vector<8x128xf32>
    %60 = arith.maximumf %58, %59 : vector<8x128xf32>
    %c0_28 = arith.constant 0 : index
    %c0_29 = arith.constant 0 : index
    %61 = vector.load %arg5[%c0_28, %c0_29] : memref<8x128xf32, #tpu.memory_space<vmem>>, vector<8x128xf32>
    tpu.vector_store %arg5[%c0_28, %c0_29], %60 {strides = array<i32>} : memref<8x128xf32, #tpu.memory_space<vmem>>, vector<8x128xf32>,
    return
  }
}

</mosaic_0001>

<bundles_post_ra>
// kernel: model_mlp_forward.1
= control target key start
LH: loop header
LB: loop body
LE: loop exit
PB: predicated region body
PF: predicated region fallthrough
CT: control target
= control target key end

     0   :  { %10 = vsyncpa [#allocation3], 0  ;;  %s1608_s0 = inlined_call_operand.vmem [shape: f32[8,64], index: 0, kind: input, shape index: {}]   ;;  %s1609_s1 = inlined_call_operand.hbm [shape: bf16[64,512], index: 1, kind: input, shape index: {}]   ;;  %s1610_s2 = inlined_call_operand.hbm [shape: bf16[512,256], index: 2, kind: input, shape index: {}]   ;;  %s1611_s3 = inlined_call_operand.hbm [shape: bf16[256,128], index: 3, kind: input, shape index: {}]   ;;  %s1612_s4 = inlined_call_operand.vmem [shape: f32[1,1664], index: 4, kind: input, shape index: {}]   ;;  %s1613_s5 = inlined_call_operand.hbm [shape: f32[8,128], index: 5, kind: output, shape index: {}]  }
   0x1   :  { %11 = vsyncpa [#allocation6], 0 }
   0x2   :  { %12 = vsyncpa [#allocation4], 0  ;;  %s1502_s18 = smov [#allocation5]  }
   0x3   :  { %s32_s19 = sshll.u32 %s1502_s18, 4  ;;  %s33_s19 = int_to_ptr.vmem [resolvable:$true] %s32_s19 }
   0x4   :  { %s1424_s20 = scalar_lea.vmem %s33_s19, 8192  ;;  %p1429_p1 = scmp.lt.s32.totalorder %s33_s19, %s33_s19 }
   0x5   :  { %p1425_p0 = scmp.ne.s32.totalorder %s33_s19, %s1424_s20  ;;  %p1430_p2 = scmp.lt.s32.totalorder %s1424_s20, %s1424_s20 }
   0x7   :  { %p1431_p3 = por %p1430_p2, %p1429_p1 }
   0x9   :  { %p1432_p4 = pnand %p1431_p3, %p1425_p0 }
   0xb   :  { %1435 = shalt.err (!%p1432_p4)
}
   0xc   :  { %s1503_s21 = smov 128   ;;  %s1504_s22 = smov 8  }
   0xd   :  { %38 = dma.hbm_to_vmem [thread:$0]  %s1610_s2, 8192, %s33_s19, [#allocation6], %s1503_s21, %s1503_s21, %s1504_s22  }
   0xe   :  { %s1505_s25 = smov [#allocation2]  }
   0xf   :  { %s20_s26 = sshll.u32 %s1505_s25, 4  ;;  %s21_s26 = int_to_ptr.vmem [resolvable:$true] %s20_s26 }
  0x10   :  { %s1444_s27 = scalar_lea.vmem %s21_s26, 2048  ;;  %p1449_p6 = scmp.lt.s32.totalorder %s21_s26, %s21_s26 }
  0x11   :  { %p1445_p5 = scmp.ne.s32.totalorder %s21_s26, %s1444_s27  ;;  %p1450_p7 = scmp.lt.s32.totalorder %s1444_s27, %s1444_s27 }
  0x13   :  { %p1451_p8 = por %p1450_p7, %p1449_p6 }
  0x15   :  { %p1452_p9 = pnand %p1451_p8, %p1445_p5 }
  0x17   :  { %1455 = shalt.err (!%p1452_p9)
}
  0x18   :  { %s1506_s28 = smov 256   ;;  %s1507_s29 = smov 16  }
  0x19   :  { %26 = dma.hbm_to_vmem [thread:$0]  %s1609_s1, 2048, %s21_s26, [#allocation3], %s1506_s28, %s1506_s28, %s1507_s29  }
  0x1a   :  { %s1508_s7 = smov [#allocation7]  }
  0x1b   :  { %s44_s8 = sshll.u32 %s1508_s7, 4  ;;  %s45_s8 = int_to_ptr.vmem [resolvable:$true] %s44_s8 }
  0x1c   :  { %s1464_s2 = scalar_lea.vmem %s45_s8, 2048  ;;  %p1469_p11 = scmp.lt.s32.totalorder %s45_s8, %s45_s8 }
  0x1d   :  { %p1465_p10 = scmp.ne.s32.totalorder %s45_s8, %s1464_s2  ;;  %p1470_p12 = scmp.lt.s32.totalorder %s1464_s2, %s1464_s2 }
  0x1f   :  { %p1471_p13 = por %p1470_p12, %p1469_p11 }
  0x21   :  { %p1472_p0 = pnand %p1471_p13, %p1465_p10 }
  0x23   :  { %1475 = shalt.err (!%p1472_p0)
}
  0x24   :  { %s1509_s9 = smov 64   ;;  %s1510_s10 = smov 4  }
  0x25   :  { %50 = dma.hbm_to_vmem [thread:$0]  %s1611_s3, 2048, %s45_s8, [#allocation6], %s1509_s9, %s1509_s9, %s1510_s10  }
  0x26   :  { %1496 = dma.done.wait [#allocation3], 2048  }
  0x27   :  { %1497 = vsyncadd [#allocation3], 4294965248 }
  0x28   :  { %1498 = dma.done.wait [#allocation6], 10240  }
  0x29   :  { %1499 = vsyncadd [#allocation6], 4294957056  ;;  %v1511_v0 = vmov 0   ;;  %v1268_v1 = vld [vmem:[#allocation2 + $0x64] ss:$16 sps:$4 sm:$0xff]   ;;  %vm166_vm0 = vcmask 523264  }
  0x2a   :  { %202 = vmatprep.mubr.bf16.mxu1 %v1511_v0  ;;  %v1270_v2 = vld [vmem:[#allocation2 + $0x60] ss:$16 sps:$4 sm:$0xff]   ;;  %178 = vmatprep.subr.bf16.mxu1 %v1268_v1  ;;  %v1271_v3 = vld [vmem:[#allocation2 + $0x44] ss:$16 sps:$4 sm:$0xff]   ;;  %v1282_v10 = vld [vmem:[#allocation2 + $0x6c] ss:$16 sps:$4 sm:$0xff]  }
  0x2b   :  { %179 = vmatpush1.bf16.msra.mxu1 %v1270_v2  ;;  %v1273_v4 = vld [vmem:[#allocation2 + $0x40] ss:$16 sps:$4 sm:$0xff]   ;;  %v1274_v5 = vld [vmem:[#allocation2 + $0x24] ss:$16 sps:$4 sm:$0xff]   ;;  %v1280_v11 = vld [vmem:[#allocation2 + $0x68] ss:$16 sps:$4 sm:$0xff]  }
  0x2c   :  { %180 = vmatprep.subr.bf16.mxu1 %v1271_v3  ;;  %v1276_v6 = vld [vmem:[#allocation2 + $0x20] ss:$16 sps:$4 sm:$0xff]   ;;  %v1277_v7 = vld [vmem:[#allocation2 + $0x4] ss:$16 sps:$4 sm:$0xff]   ;;  %v1285_v13 = vld [vmem:[#allocation2 + $0x4c] ss:$16 sps:$4 sm:$0xff]  }
  0x2d   :  { %v1279_v8 = vld [vmem:[#allocation2] ss:$16 sps:$4 sm:$0xff]   ;;  %v1283_v14 = vld [vmem:[#allocation2 + $0x48] ss:$16 sps:$4 sm:$0xff]   ;;  %v1288_v15 = vld [vmem:[#allocation2 + $0x2c] ss:$16 sps:$4 sm:$0xff]  }
  0x2e   :  { %v63_v9 = vld [vmem:[%s1608_s0] sm:$0xff]  ;;  %v1286_v16 = vld [vmem:[#allocation2 + $0x28] ss:$16 sps:$4 sm:$0xff]   ;;  %v1291_v17 = vld [vmem:[#allocation2 + $0xc] ss:$16 sps:$4 sm:$0xff]   ;;  %s1512_s22 = smov [#allocation8]  }
  0x2f   :  { %181 = vmatpush1.bf16.msra.mxu1 %v1273_v4  ;;  %v64_v12 = vpack.c.bf16 %v63_v9, %v63_v9  ;;  %v1289_v18 = vld [vmem:[#allocation2 + $0x8] ss:$16 sps:$4 sm:$0xff]   ;;  %v1292_v19 = vld [vmem:[#allocation5 + $0x74] ss:$8 sps:$4 sm:$0xff]   ;;  %v1295_v21 = vld [vmem:[#allocation5 + $0x64] ss:$8 sps:$4 sm:$0xff]  }
  0x30   :  { %182 = vmatprep.subr.bf16.mxu1 %v1274_v5  ;;  %v1294_v20 = vld [vmem:[#allocation5 + $0x70] ss:$8 sps:$4 sm:$0xff]   ;;  %786 = vmatprep.subr.bf16.mxu0 %v1292_v19  ;;  %v1297_v22 = vld [vmem:[#allocation5 + $0x60] ss:$8 sps:$4 sm:$0xff]   ;;  %v1298_v23 = vld [vmem:[#allocation5 + $0x54] ss:$8 sps:$4 sm:$0xff]  }
  0x31   :  { %787 = vmatpush1.bf16.msra.mxu0 %v1294_v20  ;;  %v1300_v24 = vld [vmem:[#allocation5 + $0x50] ss:$8 sps:$4 sm:$0xff]   ;;  %v1301_v25 = vld [vmem:[#allocation5 + $0x44] ss:$8 sps:$4 sm:$0xff]   ;;  %v1303_v26 = vld [vmem:[#allocation5 + $0x40] ss:$8 sps:$4 sm:$0xff]  }
  0x32   :  { %788 = vmatprep.subr.bf16.mxu0 %v1295_v21  ;;  %v1304_v27 = vld [vmem:[#allocation5 + $0x34] ss:$8 sps:$4 sm:$0xff]   ;;  %v1306_v29 = vld [vmem:[#allocation5 + $0x170] ss:$8 sps:$4 sm:$0xff]   ;;  %v1310_v31 = vld [vmem:[#allocation5 + $0x24] ss:$8 sps:$4 sm:$0xff]  }
  0x33   :  { %183 = vmatpush1.bf16.msra.mxu1 %v1276_v6  ;;  %v1308_v28 = vld [vmem:[#allocation5 + $0x174] ss:$8 sps:$4 sm:$0xff]   ;;  %v1309_v30 = vld [vmem:[#allocation5 + $0x30] ss:$8 sps:$4 sm:$0xff]   ;;  %v1314_v32 = vld [vmem:[#allocation5 + $0x164] ss:$8 sps:$4 sm:$0xff]  }
  0x34   :  { %184 = vmatprep.subr.bf16.mxu1 %v1277_v7  ;;  %v1312_v33 = vld [vmem:[#allocation5 + $0x160] ss:$8 sps:$4 sm:$0xff]   ;;  %v1316_v35 = vld [vmem:[#allocation5 + $0x14] ss:$8 sps:$4 sm:$0xff]   ;;  %v1318_v37 = vld [vmem:[#allocation5 + $0x150] ss:$8 sps:$4 sm:$0xff]  }
  0x35   :  { %789 = vmatpush1.bf16.msra.mxu0 %v1297_v22  ;;  %v1315_v34 = vld [vmem:[#allocation5 + $0x20] ss:$8 sps:$4 sm:$0xff]   ;;  %v1320_v36 = vld [vmem:[#allocation5 + $0x154] ss:$8 sps:$4 sm:$0xff]   ;;  %v1321_v38 = vld [vmem:[#allocation5 + $0x10] ss:$8 sps:$4 sm:$0xff]  }
  0x36   :  { %790 = vmatprep.subr.bf16.mxu0 %v1298_v23  ;;  %v1322_v39 = vld [vmem:[#allocation5 + $0x4] ss:$8 sps:$4 sm:$0xff]   ;;  %v1324_v41 = vld [vmem:[#allocation5 + $0x140] ss:$8 sps:$4 sm:$0xff]   ;;  %v1328_v43 = vld [vmem:[#allocation5 + $0xf4] ss:$8 sps:$4 sm:$0xff]  }
  0x37   :  { %185 = vmatpush1.bf16.msra.mxu1 %v1279_v8  ;;  %v1326_v40 = vld [vmem:[#allocation5 + $0x144] ss:$8 sps:$4 sm:$0xff]   ;;  %v1327_v42 = vld [vmem:[#allocation5] ss:$8 sps:$4 sm:$0xff]   ;;  %v1332_v44 = vld [vmem:[#allocation5 + $0x134] ss:$8 sps:$4 sm:$0xff]  }
  0x38   :  { %219 = vmatprep.subr.bf16.mxu1 %v1282_v10  ;;  %v1330_v45 = vld [vmem:[#allocation5 + $0x130] ss:$8 sps:$4 sm:$0xff]   ;;  %v1334_v47 = vld [vmem:[#allocation5 + $0xe4] ss:$8 sps:$4 sm:$0xff]   ;;  %v1336_v49 = vld [vmem:[#allocation5 + $0x120] ss:$8 sps:$4 sm:$0xff]  }
  0x39   :  { %791 = vmatpush1.bf16.msra.mxu0 %v1300_v24  ;;  %v1333_v46 = vld [vmem:[#allocation5 + $0xf0] ss:$8 sps:$4 sm:$0xff]   ;;  %v1338_v48 = vld [vmem:[#allocation5 + $0x124] ss:$8 sps:$4 sm:$0xff]   ;;  %v1339_v50 = vld [vmem:[#allocation5 + $0xe0] ss:$8 sps:$4 sm:$0xff]  }
  0x3a   :  { %1152 = vmatmul.mubr.msk.bf16.vlgmr.msra.gmra.mxu1 %vm166_vm0, %v64_v12  ;;  %792 = vmatprep.subr.bf16.mxu0 %v1301_v25  ;;  %v1340_v51 = vld [vmem:[#allocation5 + $0xd4] ss:$8 sps:$4 sm:$0xff]   ;;  %v1342_v53 = vld [vmem:[#allocation5 + $0x110] ss:$8 sps:$4 sm:$0xff]   ;;  %v1346_v55 = vld [vmem:[#allocation5 + $0xc4] ss:$8 sps:$4 sm:$0xff]  }
  0x3b   :  { %220 = vmatpush1.bf16.msra.mxu1 %v1280_v11  ;;  %243 = vmatprep.mubr.bf16.mxu1 %v1511_v0  ;;  %v1344_v52 = vld [vmem:[#allocation5 + $0x114] ss:$8 sps:$4 sm:$0xff]   ;;  %v1345_v54 = vld [vmem:[#allocation5 + $0xd0] ss:$8 sps:$4 sm:$0xff]   ;;  %v1350_v56 = vld [vmem:[#allocation5 + $0x104] ss:$8 sps:$4 sm:$0xff]  }
  0x3c   :  { %221 = vmatprep.subr.bf16.mxu1 %v1285_v13  ;;  %v1348_v57 = vld [vmem:[#allocation5 + $0x100] ss:$8 sps:$4 sm:$0xff]   ;;  %v1352_v59 = vld [vmem:[#allocation5 + $0xb4] ss:$8 sps:$4 sm:$0xff]   ;;  %v1354_v61 = vld [vmem:[#allocation5 + $0x1f0] ss:$8 sps:$4 sm:$0xff]  }
  0x3d   :  { %793 = vmatpush1.bf16.msra.mxu0 %v1303_v26  ;;  %v1351_v58 = vld [vmem:[#allocation5 + $0xc0] ss:$8 sps:$4 sm:$0xff]   ;;  %v1356_v60 = vld [vmem:[#allocation5 + $0x1f4] ss:$8 sps:$4 sm:$0xff]   ;;  %v1357_v62 = vld [vmem:[#allocation5 + $0xb0] ss:$8 sps:$4 sm:$0xff]  }
  0x3e   :  { %794 = vmatprep.subr.bf16.mxu0 %v1304_v27  ;;  %v1358_v63 = vld [vmem:[#allocation5 + $0xa4] ss:$8 sps:$4 sm:$0xff]   ;;  %v1360_v1 = vld [vmem:[#allocation5 + $0x1e0] ss:$8 sps:$4 sm:$0xff]   ;;  %v1364_v3 = vld [vmem:[#allocation5 + $0x94] ss:$8 sps:$4 sm:$0xff]  }
  0x3f   :  { %222 = vmatpush1.bf16.msra.mxu1 %v1283_v14  ;;  %v1362_v0 = vld [vmem:[#allocation5 + $0x1e4] ss:$8 sps:$4 sm:$0xff]   ;;  %v1363_v2 = vld [vmem:[#allocation5 + $0xa0] ss:$8 sps:$4 sm:$0xff]   ;;  %v1368_v4 = vld [vmem:[#allocation5 + $0x1d4] ss:$8 sps:$4 sm:$0xff]  }
  0x40   :  { %223 = vmatprep.subr.bf16.mxu1 %v1288_v15  ;;  %v1366_v5 = vld [vmem:[#allocation5 + $0x1d0] ss:$8 sps:$4 sm:$0xff]   ;;  %v1370_v7 = vld [vmem:[#allocation5 + $0x84] ss:$8 sps:$4 sm:$0xff]   ;;  %v1372_v9 = vld [vmem:[#allocation5 + $0x1c0] ss:$8 sps:$4 sm:$0xff]  }
  0x41   :  { %795 = vmatpush1.bf16.msra.mxu0 %v1309_v30  ;;  %v1369_v6 = vld [vmem:[#allocation5 + $0x90] ss:$8 sps:$4 sm:$0xff]   ;;  %v1374_v8 = vld [vmem:[#allocation5 + $0x1c4] ss:$8 sps:$4 sm:$0xff]   ;;  %v1375_v10 = vld [vmem:[#allocation5 + $0x80] ss:$8 sps:$4 sm:$0xff]  }
  0x42   :  { %796 = vmatprep.subr.bf16.mxu0 %v1310_v31  ;;  %v1378_v11 = vld [vmem:[#allocation5 + $0x1b4] ss:$8 sps:$4 sm:$0xff]   ;;  %v1381_v13 = vld [vmem:[#allocation5 + $0x1a4] ss:$8 sps:$4 sm:$0xff]   ;;  %v1379_v14 = vld [vmem:[#allocation5 + $0x1a0] ss:$8 sps:$4 sm:$0xff]  }
  0x43   :  { %224 = vmatpush1.bf16.msra.mxu1 %v1286_v16  ;;  %v1384_v15 = vld [vmem:[#allocation5 + $0x194] ss:$8 sps:$4 sm:$0xff]   ;;  %v1382_v16 = vld [vmem:[#allocation5 + $0x190] ss:$8 sps:$4 sm:$0xff]   ;;  %s1126_s23 = sshll.u32 %s1512_s22, 4  ;;  %s1127_s23 = int_to_ptr.vmem [resolvable:$true] %s1126_s23 }
  0x44   :  { %225 = vmatprep.subr.bf16.mxu1 %v1291_v17  ;;  %v1387_v17 = vld [vmem:[#allocation5 + $0x184] ss:$8 sps:$4 sm:$0xff]   ;;  %s1476_s24 = scalar_lea.vmem %s1127_s23, 128  ;;  %p1481_p2 = scmp.lt.s32.totalorder %s1127_s23, %s1127_s23 }
  0x45   :  { %797 = vmatpush1.bf16.msra.mxu0 %v1315_v34  ;;  %p1477_p1 = scmp.ne.s32.totalorder %s1127_s23, %s1476_s24  ;;  %p1482_p3 = scmp.lt.s32.totalorder %s1476_s24, %s1476_s24 }
  0x46   :  { %798 = vmatprep.subr.bf16.mxu0 %v1316_v35 }
  0x47   :  { %226 = vmatpush1.bf16.msra.mxu1 %v1289_v18  ;;  %v1385_v18 = vld [vmem:[#allocation5 + $0x180] ss:$8 sps:$4 sm:$0xff]   ;;  %p1483_p4 = por %p1482_p3, %p1481_p2 }
  0x48   :  { %827 = vmatprep.subr.bf16.mxu1 %v1308_v28 }
  0x49   :  { %799 = vmatpush1.bf16.msra.mxu0 %v1321_v38  ;;  %p1484_p5 = pnand %p1483_p4, %p1477_p1 }
  0x4a   :  { %1153 = vmatmul.mubr.msk.bf16.vlgmr.msra.gmra.mxu1 %vm166_vm0, %v64_v12  ;;  %800 = vmatprep.subr.bf16.mxu0 %v1322_v39  ;;  %v1376_v12 = vld [vmem:[#allocation5 + $0x1b0] ss:$8 sps:$4 sm:$0xff]  }
  0x4b   :  { %828 = vmatpush1.bf16.msra.mxu1 %v1306_v29 }
  0x4c   :  { %829 = vmatprep.subr.bf16.mxu1 %v1314_v32 }
  0x4d   :  { %801 = vmatpush1.bf16.msra.mxu0 %v1327_v42 }
  0x4e   :  { %802 = vmatprep.subr.bf16.mxu0 %v1328_v43 }
  0x4f   :  { %830 = vmatpush1.bf16.msra.mxu1 %v1312_v33 }
  0x50   :  { %831 = vmatprep.subr.bf16.mxu1 %v1320_v36 }
  0x51   :  { %803 = vmatpush2.bf16.msra.mxu0 %v1333_v46 }
  0x52   :  { %804 = vmatprep.subr.bf16.mxu0 %v1334_v47 }
  0x53   :  { %832 = vmatpush1.bf16.msra.mxu1 %v1318_v37 }
  0x54   :  { %833 = vmatprep.subr.bf16.mxu1 %v1326_v40 }
  0x55   :  { %805 = vmatpush2.bf16.msra.mxu0 %v1339_v50 }
  0x56   :  { %806 = vmatprep.subr.bf16.mxu0 %v1340_v51 }
  0x57   :  { %834 = vmatpush1.bf16.msra.mxu1 %v1324_v41 }
  0x58   :  { %835 = vmatprep.subr.bf16.mxu1 %v1332_v44 }
  0x59   :  { %807 = vmatpush2.bf16.msra.mxu0 %v1345_v54 }
  0x5a   :  { %808 = vmatprep.subr.bf16.mxu0 %v1346_v55 }
  0x5b   :  { %836 = vmatpush1.bf16.msra.mxu1 %v1330_v45 }
  0x5c   :  { %837 = vmatprep.subr.bf16.mxu1 %v1338_v48 }
  0x5d   :  { %809 = vmatpush2.bf16.msra.mxu0 %v1351_v58 }
  0x5e   :  { %810 = vmatprep.subr.bf16.mxu0 %v1352_v59 }
  0x5f   :  { %838 = vmatpush1.bf16.msra.mxu1 %v1336_v49 }
  0x60   :  { %839 = vmatprep.subr.bf16.mxu1 %v1344_v52 }
  0x61   :  { %811 = vmatpush2.bf16.msra.mxu0 %v1357_v62 }
  0x62   :  { %812 = vmatprep.subr.bf16.mxu0 %v1358_v63 }
  0x63   :  { %840 = vmatpush1.bf16.msra.mxu1 %v1342_v53 }
  0x64   :  { %841 = vmatprep.subr.bf16.mxu1 %v1350_v56 }
  0x65   :  { %813 = vmatpush2.bf16.msra.mxu0 %v1363_v2 }
  0x66   :  { %814 = vmatprep.subr.bf16.mxu0 %v1364_v3 }
  0x67   :  { %842 = vmatpush1.bf16.msra.mxu1 %v1348_v57 }
  0x68   :  { %843 = vmatprep.subr.bf16.mxu1 %v1356_v60 }
  0x69   :  { %815 = vmatpush2.bf16.msra.mxu0 %v1369_v6 }
  0x6a   :  { %816 = vmatprep.subr.bf16.mxu0 %v1370_v7 }
  0x6b   :  { %844 = vmatpush2.bf16.msra.mxu1 %v1354_v61 }
  0x6c   :  { %845 = vmatprep.subr.bf16.mxu1 %v1362_v0 }
  0x6d   :  { %817 = vmatpush2.bf16.msra.mxu0 %v1375_v10 }
  0x6f   :  { %846 = vmatpush2.bf16.msra.mxu1 %v1360_v1 }
  0x70   :  { %847 = vmatprep.subr.bf16.mxu1 %v1368_v4 }
  0x73   :  { %848 = vmatpush2.bf16.msra.mxu1 %v1366_v5 }
  0x74   :  { %849 = vmatprep.subr.bf16.mxu1 %v1374_v8 }
  0x77   :  { %850 = vmatpush2.bf16.msra.mxu1 %v1372_v9  ;;  %v325_v9 = vlaneseq }
  0x78   :  { %851 = vmatprep.subr.bf16.mxu1 %v1378_v11 }
  0x7b   :  { %852 = vmatpush2.bf16.msra.mxu1 %v1376_v12 }
  0x7c   :  { %853 = vmatprep.subr.bf16.mxu1 %v1381_v13 }
  0x7f   :  { %854 = vmatpush2.bf16.msra.mxu1 %v1379_v14 }
  0x80   :  { %855 = vmatprep.subr.bf16.mxu1 %v1384_v15 }
  0x83   :  { %856 = vmatpush2.bf16.msra.mxu1 %v1382_v16 }
  0x84   :  { %857 = vmatprep.subr.bf16.mxu1 %v1387_v17  ;;  %v326_v17 = vshrl.u32 %v325_v9, 7 }
  0x87   :  { %858 = vmatpush2.bf16.msra.mxu1 %v1385_v18 }
  0xfa   :  { %v204_v19 = vpop.f32.mrf.mxu1 }
  0xfb   :  { %v252_v20 = vrot.slane %v204_v19, 4 }
  0xfc   :  { %v206_v21 = vpop.f32.mrf.mxu1 }
  0xfd   :  { %v253_v22 = vadd.f32 %v252_v20, %v204_v19  ;;  %v258_v23 = vrot.slane %v206_v21, 4 }
  0xfe   :  { %v208_v24 = vpop.f32.mrf.mxu1 }
  0xff   :  { %v254_v25 = vrot.slane %v253_v22, 2  ;;  %v259_v26 = vadd.f32 %v258_v23, %v206_v21 }
 0x100   :  { %v209_v27 = vpop.f32.mrf.mxu1 }
 0x101   :  { %v255_v28 = vadd.f32 %v254_v25, %v253_v22  ;;  %v260_v29 = vrot.slane %v259_v26, 2  ;;  %v1569_v22 = vsub.s32 0, %v326_v17  ;;  %v65_v25 = vld [vmem:[%s1612_s4] sm:$0xf] }
 0x103   :  { %v256_v30 = vrot.slane %v255_v28, 1  ;;  %v261_v31 = vadd.f32 %v260_v29, %v259_v26  ;;  %v328_v29 = vrot.slane %v65_v25, %v1569_v22 }
 0x105   :  { %v257_v32 = vadd.f32 %v256_v30, %v255_v28  ;;  %v262_v33 = vrot.slane %v261_v31, 1  ;;  %v1574_v28 = vsub.s32 1, %v326_v17 }
 0x107   :  { %v276_v34 = vmul.f32 0.125, %v257_v32  ;;  %v263_v35 = vadd.f32 %v262_v33, %v261_v31 }
 0x109   :  { %v1557_v36 = vsub.f32 %v204_v19, %v276_v34  ;;  %v277_v37 = vmul.f32 0.125, %v263_v35  ;;  %v66_v34 = vld [vmem:[%s1612_s4 + $0x4] sm:$0xf]  ;;  %v332_v35 = vrot.slane %v65_v25, %v1574_v28 }
 0x10a   :  { %v245_v38 = vpop.f32.mrf.mxu1 }
 0x10b   :  { %v284_v39 = vmul.f32 %v1557_v36, %v1557_v36  ;;  %v1561_v40 = vsub.f32 %v206_v21, %v277_v37  ;;  %v264_v41 = vrot.slane %v245_v38, 4 }
 0x10c   :  { %v247_v42 = vpop.f32.mrf.mxu1 }
 0x10d   :  { %v288_v43 = vrot.slane %v284_v39, 4  ;;  %v285_v44 = vmul.f32 %v1561_v40, %v1561_v40  ;;  %v265_v45 = vadd.f32 %v264_v41, %v245_v38  ;;  %v270_v46 = vrot.slane %v247_v42, 4 }
 0x10e   :  { %v249_v47 = vpop.f32.mrf.mxu1 }
 0x10f   :  { %v289_v48 = vadd.f32 %v288_v43, %v284_v39  ;;  %v294_v49 = vrot.slane %v285_v44, 4  ;;  %v266_v50 = vrot.slane %v265_v45, 2  ;;  %v271_v51 = vadd.f32 %v270_v46, %v247_v42 }
 0x110   :  { %v250_v52 = vpop.f32.mrf.mxu1  ;;  %v373_v43 = vrot.slane %v66_v34, %v1569_v22 }
 0x111   :  { %v290_v53 = vrot.slane %v289_v48, 2  ;;  %v295_v54 = vadd.f32 %v294_v49, %v285_v44  ;;  %v267_v55 = vadd.f32 %v266_v50, %v265_v45  ;;  %v272_v56 = vrot.slane %v271_v51, 2 }
 0x112   :  { %v377_v49 = vrot.slane %v66_v34, %v1574_v28  ;;  %v335_v52 = vsub.s32 2, %v326_v17 }
 0x113   :  { %v291_v57 = vadd.f32 %v290_v53, %v289_v48  ;;  %v296_v58 = vrot.slane %v295_v54, 2  ;;  %v268_v59 = vrot.slane %v267_v55, 1  ;;  %v273_v60 = vadd.f32 %v272_v56, %v271_v51 }
 0x115   :  { %v292_v61 = vrot.slane %v291_v57, 1  ;;  %v297_v62 = vadd.f32 %v296_v58, %v295_v54  ;;  %v269_v63 = vadd.f32 %v268_v59, %v267_v55  ;;  %v274_v0 = vrot.slane %v273_v60, 1 }
 0x116   :  { %v339_v55 = vsub.s32 3, %v326_v17  ;;  %v1393_v17 = vld [vmem:[#allocation7 + $0x28] sm:$0xff]  }
 0x117   :  { %v293_v1 = vadd.f32 %v292_v61, %v291_v57  ;;  %v298_v2 = vrot.slane %v297_v62, 1  ;;  %v278_v3 = vmul.f32 0.125, %v269_v63  ;;  %v275_v4 = vadd.f32 %v274_v0, %v273_v60 }
 0x118   :  { %v336_v57 = vrot.slane %v65_v25, %v335_v52  ;;  %v340_v60 = vrot.slane %v65_v25, %v339_v55  ;;  %v1401_v25 = vld [vmem:[#allocation7 + $0x8] sm:$0xff]  }
 0x119   :  { %v312_v5 = vmul.f32 0.125, %v293_v1  ;;  %v299_v6 = vadd.f32 %v298_v2, %v297_v62  ;;  %v1565_v7 = vsub.f32 %v245_v38, %v278_v3  ;;  %v279_v8 = vmul.f32 0.125, %v275_v4 }
 0x11a   :  { %v381_v1 = vrot.slane %v66_v34, %v335_v52  ;;  %v385_v3 = vrot.slane %v66_v34, %v339_v55 }
 0x11b   :  { %v316_v10 = vadd.f32 1e-05, %v312_v5  ;;  %v313_v11 = vmul.f32 0.125, %v299_v6  ;;  %v286_v12 = vmul.f32 %v1565_v7, %v1565_v7  ;;  %v283_v13 = vsub.f32 %v247_v42, %v279_v8 }
 0x11d   :  { %1404 = vrsqrt.f32 %v316_v10  ;;  %v317_v14 = vadd.f32 1e-05, %v313_v11  ;;  %v300_v15 = vrot.slane %v286_v12, 4  ;;  %v287_v16 = vmul.f32 %v283_v13, %v283_v13 }
 0x11f   :  { %1406 = vrsqrt.f32 %v317_v14  ;;  %v301_v18 = vadd.f32 %v300_v15, %v286_v12  ;;  %v306_v19 = vrot.slane %v287_v16, 4  ;;  %v1388_v12 = vld [vmem:[#allocation7 + $0x78] sm:$0xff]   ;;  %v1390_v15 = vld [vmem:[#allocation7 + $0x70] sm:$0xff]  }
 0x120   :  { %v1389_v14 = vld [vmem:[#allocation7 + $0x38] sm:$0xff]   ;;  %1235 = vmatprep.subr.bf16.mxu0 %v1388_v12 }
 0x121   :  { %v302_v20 = vrot.slane %v301_v18, 2  ;;  %v307_v21 = vadd.f32 %v306_v19, %v287_v16  ;;  %v1391_v16 = vld [vmem:[#allocation7 + $0x30] sm:$0xff]   ;;  %v1396_v19 = vld [vmem:[#allocation7 + $0x58] sm:$0xff]  }
 0x123   :  { %v303_v23 = vadd.f32 %v302_v20, %v301_v18  ;;  %v308_v24 = vrot.slane %v307_v21, 2  ;;  %v1395_v18 = vld [vmem:[#allocation7 + $0x20] sm:$0xff]   ;;  %v1397_v20 = vld [vmem:[#allocation7 + $0x18] sm:$0xff]  }
 0x125   :  { %v304_v26 = vrot.slane %v303_v23, 1  ;;  %v309_v27 = vadd.f32 %v308_v24, %v307_v21  ;;  %v1398_v21 = vld [vmem:[#allocation7 + $0x50] sm:$0xff]   ;;  %v1400_v24 = vld [vmem:[#allocation7 + $0x48] sm:$0xff]  }
 0x127   :  { %v305_v30 = vadd.f32 %v304_v26, %v303_v23  ;;  %v310_v31 = vrot.slane %v309_v27, 1  ;;  %v1399_v23 = vld [vmem:[#allocation7 + $0x10] sm:$0xff]   ;;  %v1402_v26 = vld [vmem:[#allocation7 + $0x40] sm:$0xff]  }
 0x129   :  { %v314_v32 = vmul.f32 0.125, %v305_v30  ;;  %v311_v33 = vadd.f32 %v310_v31, %v309_v27  ;;  %v1403_v27 = vld [vmem:[#allocation7] sm:$0xff]  }
 0x12a   :  { %v1405_v37 = vpop.eup %1404 }
 0x12b   :  { %v345_v38 = vmul.f32 %v1405_v37, %v328_v29  ;;  %v318_v39 = vadd.f32 1e-05, %v314_v32  ;;  %v315_v41 = vmul.f32 0.125, %v311_v33 }
 0x12c   :  { %v1407_v42 = vpop.eup %1406 }
 0x12d   :  { %v352_v44 = vrot.slane %v345_v38, %v1569_v22  ;;  %1408 = vrsqrt.f32 %v318_v39  ;;  %v319_v45 = vadd.f32 1e-05, %v315_v41  ;;  %v346_v46 = vmul.f32 %v1407_v42, %v332_v35 }
 0x12f   :  { %v365_v47 = vmul.f32 %v352_v44, %v1557_v36  ;;  %1410 = vrsqrt.f32 %v319_v45  ;;  %v356_v48 = vrot.slane %v346_v46, %v1569_v22 }
 0x131   :  { %v366_v50 = vmul.f32 %v356_v48, %v1561_v40  ;;  %v390_v51 = vadd.f32 %v373_v43, %v365_v47 }
 0x133   :  { %v391_v53 = vadd.f32 %v377_v49, %v366_v50  ;;  %v394_v54 = vmax.f32 %v390_v51, 0.0 }
 0x135   :  { %v395_v56 = vmax.f32 %v391_v53, 0.0  ;;  %v398_v59 = vpack.c.bf16 %v394_v54, %v394_v54 }
 0x137   :  { %v399_v58 = vpack.c.bf16 %v395_v56, %v395_v56 }
 0x139   :  { %818 = vmatprep.mubr.bf16.mxu0 %v399_v58 }
 0x13a   :  { %v1409_v61 = vpop.eup %1408  ;;  %819 = vmatmul.mubr.bf16.vlgmr.msra.gmra.mxu0 %v398_v59 }
 0x13b   :  { %v347_v36 = vmul.f32 %v1409_v61, %v336_v57  ;;  %1236 = vmatpush3.bf16.msra.mxu0 %v1389_v14 }
 0x13c   :  { %v1411_v62 = vpop.eup %1410  ;;  %1237 = vmatprep.subr.bf16.mxu0 %v1390_v15  ;;  %v68_v15 = vld [vmem:[%s1612_s4 + $0xa] sm:$0x3] }
 0x13d   :  { %v360_v63 = vrot.slane %v347_v36, %v1569_v22  ;;  %v348_v0 = vmul.f32 %v1411_v62, %v340_v60 }
 0x13f   :  { %v367_v40 = vmul.f32 %v360_v63, %v1565_v7  ;;  %v364_v2 = vrot.slane %v348_v0, %v1569_v22  ;;  %1238 = vmatpush3.bf16.msra.mxu0 %v1391_v16  ;;  %v1392_v7 = vld [vmem:[#allocation7 + $0x68] sm:$0xff]  }
 0x140   :  { %1239 = vmatprep.subr.bf16.mxu0 %v1392_v7 }
 0x141   :  { %v368_v4 = vmul.f32 %v364_v2, %v283_v13  ;;  %v392_v5 = vadd.f32 %v381_v1, %v367_v40  ;;  %v1394_v13 = vld [vmem:[#allocation7 + $0x60] sm:$0xff]  }
 0x143   :  { %v393_v6 = vadd.f32 %v385_v3, %v368_v4  ;;  %v396_v8 = vmax.f32 %v392_v5, 0.0  ;;  %1240 = vmatpush3.bf16.msra.mxu0 %v1393_v17 }
 0x144   :  { %1241 = vmatprep.subr.bf16.mxu0 %v1394_v13 }
 0x145   :  { %v397_v9 = vmax.f32 %v393_v6, 0.0  ;;  %v400_v11 = vpack.c.bf16 %v396_v8, %v396_v8 }
 0x147   :  { %v401_v10 = vpack.c.bf16 %v397_v9, %v397_v9  ;;  %1242 = vmatpush3.bf16.msra.mxu0 %v1395_v18  ;;  %v931_v18 = vrot.slane %v68_v15, %v1569_v22 }
 0x148   :  { %1243 = vmatprep.subr.bf16.mxu0 %v1396_v19 }
 0x149   :  { %859 = vmatprep.mubr.bf16.mxu1 %v401_v10  ;;  %v67_v10 = vld [vmem:[%s1612_s4 + $0x8] sm:$0x3] }
 0x14a   :  { %860 = vmatmul.mubr.bf16.vlgmr.msra.gmra.mxu1 %v400_v11  ;;  %v908_v11 = vrot.slane %v67_v10, %v1569_v22  ;;  %v912_v12 = vrot.slane %v67_v10, %v1574_v28 }
 0x14b   :  { %1244 = vmatpush3.bf16.msra.mxu0 %v1397_v20 }
 0x14c   :  { %1245 = vmatprep.subr.bf16.mxu0 %v1398_v21  ;;  %v935_v21 = vrot.slane %v68_v15, %v1574_v28 }
 0x14f   :  { %1246 = vmatpush3.bf16.msra.mxu0 %v1399_v23 }
 0x150   :  { %1247 = vmatprep.subr.bf16.mxu0 %v1400_v24 }
 0x153   :  { %1248 = vmatpush3.bf16.msra.mxu0 %v1401_v25 }
 0x154   :  { %1249 = vmatprep.subr.bf16.mxu0 %v1402_v26 }
 0x157   :  { %1250 = vmatpush3.bf16.msra.mxu0 %v1403_v27 }
 0x1fa   :  { %v820_v29 = vpop.f32.mrf.mxu0 }
 0x1fc   :  { %v822_v30 = vpop.f32.mrf.mxu0 }
 0x1fe   :  { %v824_v31 = vpop.f32.mrf.mxu0 }
 0x200   :  { %v825_v32 = vpop.f32.mrf.mxu0 }
 0x201   :  { %v1218_v32 = vld [vmem:[%s1612_s4 + $0xc] ss:$0 sm:$0xff] }
 0x20a   :  { %v861_v33 = vpop.f32.mrf.mxu1 }
 0x20b   :  { %v862_v34 = vadd.f32 %v861_v33, %v820_v29 }
 0x20c   :  { %v863_v35 = vpop.f32.mrf.mxu1 }
 0x20d   :  { %v868_v37 = vrot.slane %v862_v34, 4  ;;  %v864_v38 = vadd.f32 %v863_v35, %v822_v30 }
 0x20e   :  { %v865_v39 = vpop.f32.mrf.mxu1 }
 0x20f   :  { %v869_v41 = vadd.f32 %v868_v37, %v862_v34  ;;  %v874_v42 = vrot.slane %v864_v38, 4 }
 0x210   :  { %v866_v43 = vpop.f32.mrf.mxu1 }
 0x211   :  { %v870_v44 = vrot.slane %v869_v41, 2  ;;  %v875_v45 = vadd.f32 %v874_v42, %v864_v38 }
 0x213   :  { %v871_v46 = vadd.f32 %v870_v44, %v869_v41  ;;  %v876_v47 = vrot.slane %v875_v45, 2 }
 0x215   :  { %v872_v48 = vrot.slane %v871_v46, 1  ;;  %v877_v49 = vadd.f32 %v876_v47, %v875_v45 }
 0x217   :  { %v873_v50 = vadd.f32 %v872_v48, %v871_v46  ;;  %v878_v51 = vrot.slane %v877_v49, 1 }
 0x219   :  { %v880_v52 = vmul.f32 0.125, %v873_v50  ;;  %v879_v53 = vadd.f32 %v878_v51, %v877_v49 }
 0x21b   :  { %v882_v54 = vsub.f32 %v862_v34, %v880_v52  ;;  %v881_v55 = vmul.f32 0.125, %v879_v53 }
 0x21d   :  { %v884_v56 = vmul.f32 %v882_v54, %v882_v54  ;;  %v883_v57 = vsub.f32 %v864_v38, %v881_v55 }
 0x21f   :  { %v886_v58 = vrot.slane %v884_v56, 4  ;;  %v885_v59 = vmul.f32 %v883_v57, %v883_v57 }
 0x221   :  { %v887_v60 = vadd.f32 %v886_v58, %v884_v56  ;;  %v892_v61 = vrot.slane %v885_v59, 4 }
 0x223   :  { %v888_v36 = vrot.slane %v887_v60, 2  ;;  %v893_v62 = vadd.f32 %v892_v61, %v885_v59 }
 0x225   :  { %v889_v63 = vadd.f32 %v888_v36, %v887_v60  ;;  %v894_v0 = vrot.slane %v893_v62, 2 }
 0x227   :  { %v890_v1 = vrot.slane %v889_v63, 1  ;;  %v895_v40 = vadd.f32 %v894_v0, %v893_v62 }
 0x229   :  { %v891_v2 = vadd.f32 %v890_v1, %v889_v63  ;;  %v896_v3 = vrot.slane %v895_v40, 1 }
 0x22b   :  { %v898_v4 = vmul.f32 0.125, %v891_v2  ;;  %v897_v5 = vadd.f32 %v896_v3, %v895_v40 }
 0x22d   :  { %v900_v6 = vadd.f32 1e-05, %v898_v4  ;;  %v899_v8 = vmul.f32 0.125, %v897_v5 }
 0x22f   :  { %1412 = vrsqrt.f32 %v900_v6  ;;  %v901_v9 = vadd.f32 1e-05, %v899_v8 }
 0x231   :  { %1414 = vrsqrt.f32 %v901_v9 }
 0x23c   :  { %v1413_v14 = vpop.eup %1412 }
 0x23d   :  { %v915_v16 = vmul.f32 %v1413_v14, %v908_v11 }
 0x23e   :  { %v1415_v7 = vpop.eup %1414 }
 0x23f   :  { %v920_v17 = vrot.slane %v915_v16, %v1569_v22  ;;  %v916_v13 = vmul.f32 %v1415_v7, %v912_v12 }
 0x241   :  { %v925_v19 = vmul.f32 %v920_v17, %v882_v54  ;;  %v924_v20 = vrot.slane %v916_v13, %v1569_v22 }
 0x243   :  { %v926_v23 = vmul.f32 %v924_v20, %v883_v57  ;;  %v938_v24 = vadd.f32 %v931_v18, %v925_v19 }
 0x245   :  { %v939_v25 = vadd.f32 %v935_v21, %v926_v23  ;;  %v940_v26 = vmax.f32 %v938_v24, 0.0 }
 0x247   :  { %v941_v27 = vmax.f32 %v939_v25, 0.0  ;;  %v942_v30 = vpack.c.bf16 %v940_v26, %v940_v26 }
 0x249   :  { %v943_v29 = vpack.c.bf16 %v941_v27, %v941_v27 }
 0x24b   :  { %1110 = vmatprep.mubr.bf16.mxu0 %v943_v29 }
 0x24c   :  { %1111 = vmatmul.mubr.bf16.vlgmr.msra.gmra.mxu0 %v942_v30 }
 0x30c   :  { %v1251_v31 = vpop.f32.mrf.mxu0 }
 0x30e   :  { %v1252_v33 = vpop.f32.mrf.mxu0 }
 0x30f   :  { %v1253_v34 = vadd.f32 %v1252_v33, %v1251_v31 }
 0x310   :  { %v1254_v35 = vpop.f32.mrf.mxu0 }
 0x311   :  { %v1113_v22 = vadd.f32 %v1253_v34, %v1218_v32 }
 0x312   :  { %v1255_v28 = vpop.f32.mrf.mxu0 }
 0x313   :  { %v1118_v37 = vmax.f32 %v1113_v22, 0.0 }
 0x315   :  { %1119 = vst [vmem:[#allocation8] sm:$0xff] %v1118_v37 }
 0x316   :  { %1487 = shalt.err (!%p1484_p5)
}
 0x317   :  { %1129 = dma.vmem_to_hbm [thread:$0]  %s1127_s23, 128, %s1613_s5, [#allocation4]  }
 0x318   :  { %1500 = dma.done.wait [#allocation4], 128  }
 0x319   :  { %1501 = vsyncadd [#allocation4], 4294967168 }
 0x31a   :  { %1133 = vsyncpa [#allocation3], 1 }
 0x31b   :  { %1134 = vsyncpa [#allocation6], 1 }
 0x31c   :  { %1135 = vsyncpa [#allocation4], 1 }

</bundles_post_ra>
